<compile_context>
chip_gen: v7x
topology: tpu7x:2x2x1
jax: 0.10.0
libtpu: 0.0.40
codegen_flags: <defaults>
</compile_context>

<pallas_src>
import jax
import jax.numpy as jnp
from jax import lax
from jax.experimental import pallas as pl
from jax.experimental.pallas import tpu as pltpu


def _make_kernel(use_mxu_layer2: bool):
    def kernel(x_ref, w1_ref, b1_ref, w2_ref, o_ref):
        # Layer 1 on the MXU, transposed orientation (batch on lanes):
        #   h[n_neurons, TM] = W1[n_neurons, d] @ x[TM, d]^T
        h = lax.dot_general(
            w1_ref[...], x_ref[...],
            dimension_numbers=(((1,), (1,)), ((), ())),
            preferred_element_type=jnp.float32,
        )
        # Bias broadcast along the lane (batch) axis + ReLU, fused in-register.
        h = jnp.maximum(h + b1_ref[...], 0.0)

        if use_mxu_layer2:
            # Wide hidden layer: fold the n_neurons reduction onto the MXU
            # ([n,1]^T-contraction with [n,tm] -> [1,tm], still lane-dense).
            o_ref[...] = lax.dot_general(
                w2_ref[...], h,
                dimension_numbers=(((0,), (0,)), ((), ())),
                preferred_element_type=jnp.float32,
            )
        else:
            # Typical case: VPU multiply + sublane reduce; MXU stays free and
            # there is no 1-lane MXU result drain.
            o_ref[...] = jnp.sum(h * w2_ref[...], axis=0, keepdims=True)

    return kernel


def _vmem_limit_bytes() -> int:
    # Ask the runtime for VMEM capacity when possible; otherwise assume the
    # smallest generation (v7x: 64 MiB per TensorCore) so sizing is safe
    # everywhere. Leave headroom for compiler scratch / semaphores.
    cap = None
    try:
        cap = getattr(pltpu.get_tpu_info(), "vmem_capacity_bytes", None)
    except Exception:
        cap = None
    if not isinstance(cap, int) or cap <= 0:
        cap = 64 << 20
    return max(32 << 20, min(cap - (8 << 20), 100 << 20))


def _pick_batch_tile(B, d, n_neurons, x_bytes, vmem_budget):
    """Pick the batch tile (multiple of 128) from a VMEM byte budget."""

    def usage(tm, x_bufs=2):
        return (x_bufs * tm * d * x_bytes      # streamed x tiles
                + n_neurons * d * x_bytes      # single-buffered W1
                + 2 * n_neurons * 4            # b1 + w2 columns (f32)
                + n_neurons * tm * 4           # layer-1 intermediate h (f32)
                + 2 * tm * 4)                  # double-buffered [1, tm] output

    b128 = pl.cdiv(B, 128) * 128
    # Cap so the grid has >= 2 steps when the batch allows it (keeps both v7x
    # TensorCores busy), and never more than 8192 rows per tile.
    if b128 < 256:
        tm_cap = 128
    else:
        tm_cap = min(8192, max(128, (b128 // 2) // 128 * 128))

    tm_fit = tm_cap
    while tm_fit > 128 and usage(tm_fit) > vmem_budget:
        tm_fit -= 128
    # TODO(synk): if usage(128) still exceeds the budget (very large d *
    # n_neurons, esp. on v7x's 64 MiB VMEM), add an n_neurons-chunked
    # accumulator loop so the full h[n_neurons, tm] never materializes.

    # Prefer a tile that divides the 128-padded batch (minimal padding); fall
    # back to the budget-limited maximum if no divisor comes close to it.
    n_blocks = b128 // 128
    tm_div = 128
    for k in range(tm_fit // 128, 0, -1):
        if n_blocks % k == 0:
            tm_div = 128 * k
            break
    tm = tm_div if 2 * tm_div >= tm_fit else tm_fit

    x_buffers = 3 if usage(tm, 3) <= vmem_budget else 2
    return tm, x_buffers


def auxnet_forward(x, w1, b1, w2, *, use_bf16_mxu: bool = False):
    """x: [B, d], w1: [n_neurons, d], b1: [n_neurons], w2: [1, n_neurons] -> [B, 1]."""
    B, d = x.shape
    n_neurons = w1.shape[0]

    # Stream the MXU operands in the caller's precision: bf16 x stays bf16
    # (f32 accumulation via preferred_element_type); f32 stays f32 by default
    # so the result matches the PyTorch reference exactly.
    if x.dtype == jnp.bfloat16 or use_bf16_mxu:
        mxu_dtype = jnp.bfloat16
        x_bytes = 2
    else:
        mxu_dtype = jnp.float32
        x_bytes = 4

    vmem_limit = _vmem_limit_bytes()
    tm, x_buffers = _pick_batch_tile(B, d, n_neurons, x_bytes,
                                     int(0.7 * vmem_limit))

    # Pad the batch up to a multiple of the (multiple-of-128) tile so every
    # tile is full-extent and output stores are unmasked lane-dense vst.
    B_pad = pl.cdiv(B, tm) * tm
    x_in = x.astype(mxu_dtype)
    if B_pad != B:
        x_in = jnp.pad(x_in, ((0, B_pad - B), (0, 0)))
    grid = (B_pad // tm,)

    # Tiny once-per-call relayouts (bytes-scale); W1 stays in its native
    # [n_neurons, d] layout (transposed contraction is free on the MXU).
    w1_in = w1.astype(mxu_dtype)
    b1_col = b1.reshape(n_neurons, 1).astype(jnp.float32)
    w2_col = w2.reshape(n_neurons, 1).astype(jnp.float32)

    use_mxu_layer2 = n_neurons >= 6 * d
    kernel = _make_kernel(use_mxu_layer2)

    cost = pl.CostEstimate(
        flops=2 * B_pad * d * n_neurons + 2 * B_pad * n_neurons,
        transcendentals=0,
        bytes_accessed=(x_bytes * (B_pad * d + n_neurons * d)
                        + 4 * (2 * n_neurons + B_pad)),
    )

    def _run(single_buffer_weights: bool):
        if single_buffer_weights:
            inv_kw = dict(pipeline_mode=pl.Buffered(1))
            x_kw = (dict(pipeline_mode=pl.Buffered(3))
                    if (x_buffers == 3 and grid[0] >= 3) else {})
        else:
            inv_kw, x_kw = {}, {}
        return pl.pallas_call(
            kernel,
            out_shape=jax.ShapeDtypeStruct((1, B_pad), jnp.float32),
            grid=grid,
            in_specs=[
                # x: streamed / multi-buffered over the batch grid.
                pl.BlockSpec((tm, d), lambda i: (i, 0),
                             memory_space=pltpu.MemorySpace.VMEM, **x_kw),
                # Weights / bias: grid-invariant -> single VMEM-resident copy.
                pl.BlockSpec((n_neurons, d), lambda i: (0, 0),
                             memory_space=pltpu.MemorySpace.VMEM, **inv_kw),
                pl.BlockSpec((n_neurons, 1), lambda i: (0, 0),
                             memory_space=pltpu.MemorySpace.VMEM, **inv_kw),
                pl.BlockSpec((n_neurons, 1), lambda i: (0, 0),
                             memory_space=pltpu.MemorySpace.VMEM, **inv_kw),
            ],
            # Lane-dense output: batch on the lane axis.
            out_specs=pl.BlockSpec((1, tm), lambda i: (0, i),
                                   memory_space=pltpu.MemorySpace.VMEM),
            compiler_params=pltpu.CompilerParams(
                dimension_semantics=("parallel",),  # megacore-shardable batch
                vmem_limit_bytes=vmem_limit,
            ),
            cost_estimate=cost,
        )(x_in, w1_in, b1_col, w2_col)

    try:
        out_row = _run(single_buffer_weights=True)
    except Exception:
        # JAX build without BlockSpec(pipeline_mode=...): fall back to the
        # default double-buffered pipeline (identical results).
        out_row = _run(single_buffer_weights=False)

    return out_row[0, :B].reshape(B, 1)


if __name__ == "__main__":
    # Shapes implied by the module: x [B, d]; linear1: [n_neurons, d] + bias
    # [n_neurons]; linear2: [1, n_neurons] (no bias). fit_intercept=True.
    B, d, n_neurons = 8, 16, 32

    key = jax.random.PRNGKey(0)
    kx, k1, kb, k2 = jax.random.split(key, 4)
    x = jax.random.normal(kx, (B, d), dtype=jnp.float32)
    w1 = jax.random.normal(k1, (n_neurons, d), dtype=jnp.float32) * 0.1
    b1 = jax.random.normal(kb, (n_neurons,), dtype=jnp.float32) * 0.1
    w2 = jax.random.normal(k2, (1, n_neurons), dtype=jnp.float32) * 0.1

    out = auxnet_forward(x, w1, b1, w2)
    jax.block_until_ready(out)

    # Reference check in plain JAX (same math as the PyTorch forward).
    ref = jnp.maximum(x @ w1.T + b1, 0.0) @ w2.T
    assert out.shape == (B, 1)
    assert jnp.allclose(out, ref, atol=1e-5, rtol=1e-5)

    print("KERNEL_OK")
</pallas_src>

<mosaic_0001>
module attributes {stable_mosaic.version = 11 : i64} {
  func.func @kernel(%arg0: i32, %arg1: memref<128x16xf32, #tpu.memory_space<vmem>>, %arg2: memref<32x16xf32, #tpu.memory_space<vmem>>, %arg3: memref<32x1xf32, #tpu.memory_space<vmem>>, %arg4: memref<32x1xf32, #tpu.memory_space<vmem>>, %arg5: memref<1x128xf32, #tpu.memory_space<vmem>>) attributes {dimension_semantics = [#tpu.dimension_semantics<parallel>], iteration_bounds = array<i64: 1>, scalar_prefetch = 0 : i64, scratch_operands = 0 : i64, tpu.core_type = #tpu.core_type<tc>, window_params = [{transform_indices = @transform_0, window_bounds = array<i64: 128, 16>}, {pipeline_mode = #tpu.pipeline_mode<synchronous>, transform_indices = @transform_1, window_bounds = array<i64: 32, 16>}, {pipeline_mode = #tpu.pipeline_mode<synchronous>, transform_indices = @transform_2, window_bounds = array<i64: 32, 1>}, {pipeline_mode = #tpu.pipeline_mode<synchronous>, transform_indices = @transform_3, window_bounds = array<i64: 32, 1>}, {transform_indices = @transform_4, window_bounds = array<i64: 1, 128>}]} {
    %c0 = arith.constant 0 : index
    %c0_0 = arith.constant 0 : index
    %0 = vector.load %arg2[%c0, %c0_0] : memref<32x16xf32, #tpu.memory_space<vmem>>, vector<32x16xf32>
    %c0_1 = arith.constant 0 : index
    %c0_2 = arith.constant 0 : index
    %1 = vector.load %arg1[%c0_1, %c0_2] : memref<128x16xf32, #tpu.memory_space<vmem>>, vector<128x16xf32>
    %cst = arith.constant dense<0.000000e+00> : vector<32x128xf32>
    %2 = tpu.matmul %0, %1, %cst {dimension_numbers = #tpu.dot_dimension_numbers<[1], [1], [0], [0], [0, 0, 1, 0], [], []>} : vector<32x16xf32>, vector<128x16xf32>, vector<32x128xf32> -> vector<32x128xf32>
    %c0_3 = arith.constant 0 : index
    %c0_4 = arith.constant 0 : index
    %3 = vector.load %arg3[%c0_3, %c0_4] : memref<32x1xf32, #tpu.memory_space<vmem>>, vector<32x1xf32>
    %4 = vector.broadcast %3 : vector<32x1xf32> to vector<32x128xf32>
    %5 = arith.addf %2, %4 : vector<32x128xf32>
    %cst_5 = arith.constant 0.000000e+00 : f32
    %6 = vector.broadcast %cst_5 : f32 to vector<32x128xf32>
    %7 = arith.maximumf %5, %6 : vector<32x128xf32>
    %c0_6 = arith.constant 0 : index
    %c0_7 = arith.constant 0 : index
    %8 = vector.load %arg4[%c0_6, %c0_7] : memref<32x1xf32, #tpu.memory_space<vmem>>, vector<32x1xf32>
    %9 = vector.broadcast %8 : vector<32x1xf32> to vector<32x128xf32>
    %10 = arith.mulf %7, %9 : vector<32x128xf32>
    %cst_8 = arith.constant dense<0.000000e+00> : vector<128xf32>
    %11 = vector.multi_reduction <add>, %10, %cst_8 [0] : vector<32x128xf32> to vector<128xf32>
    %12 = vector.shape_cast %11 : vector<128xf32> to vector<1x128xf32>
    %c0_9 = arith.constant 0 : index
    %c0_10 = arith.constant 0 : index
    %13 = vector.load %arg5[%c0_9, %c0_10] : memref<1x128xf32, #tpu.memory_space<vmem>>, vector<1x128xf32>
    tpu.vector_store %arg5[%c0_9, %c0_10], %12 {strides = array<i32>} : memref<1x128xf32, #tpu.memory_space<vmem>>, vector<1x128xf32>,
    return
  }
  func.func @transform_0(%arg0: i32) -> (i32, i32) {
    %c0_i32 = arith.constant 0 : i32
    %c0_i32_0 = arith.constant 0 : i32
    return %arg0, %c0_i32 : i32, i32
  }
  func.func @transform_1(%arg0: i32) -> (i32, i32) {
    %c0_i32 = arith.constant 0 : i32
    %c0_i32_0 = arith.constant 0 : i32
    %c0_i32_1 = arith.constant 0 : i32
    return %c0_i32, %c0_i32_0 : i32, i32
  }
  func.func @transform_2(%arg0: i32) -> (i32, i32) {
    %c0_i32 = arith.constant 0 : i32
    %c0_i32_0 = arith.constant 0 : i32
    %c0_i32_1 = arith.constant 0 : i32
    return %c0_i32, %c0_i32_0 : i32, i32
  }
  func.func @transform_3(%arg0: i32) -> (i32, i32) {
    %c0_i32 = arith.constant 0 : i32
    %c0_i32_0 = arith.constant 0 : i32
    %c0_i32_1 = arith.constant 0 : i32
    return %c0_i32, %c0_i32_0 : i32, i32
  }
  func.func @transform_4(%arg0: i32) -> (i32, i32) {
    %c0_i32 = arith.constant 0 : i32
    %c0_i32_0 = arith.constant 0 : i32
    return %c0_i32, %arg0 : i32, i32
  }
}

module attributes {stable_mosaic.version = 11 : i64} {
  func.func @kernel(%arg0: i32, %arg1: memref<128x16xf32, #tpu.memory_space<vmem>>, %arg2: memref<32x16xf32, #tpu.memory_space<vmem>>, %arg3: memref<32x1xf32, #tpu.memory_space<vmem>>, %arg4: memref<32x1xf32, #tpu.memory_space<vmem>>, %arg5: memref<1x128xf32, #tpu.memory_space<vmem>>) attributes {dimension_semantics = [#tpu.dimension_semantics<parallel>], iteration_bounds = array<i64: 1>, scalar_prefetch = 0 : i64, scratch_operands = 0 : i64, tpu.core_type = #tpu.core_type<tc>, window_params = [{transform_indices = @transform_0, window_bounds = array<i64: 128, 16>}, {pipeline_mode = #tpu.pipeline_mode<synchronous>, transform_indices = @transform_1, window_bounds = array<i64: 32, 16>}, {pipeline_mode = #tpu.pipeline_mode<synchronous>, transform_indices = @transform_2, window_bounds = array<i64: 32, 1>}, {pipeline_mode = #tpu.pipeline_mode<synchronous>, transform_indices = @transform_3, window_bounds = array<i64: 32, 1>}, {transform_indices = @transform_4, window_bounds = array<i64: 1, 128>}]} {
    %c0 = arith.constant 0 : index
    %c0_0 = arith.constant 0 : index
    %0 = vector.load %arg2[%c0, %c0_0] : memref<32x16xf32, #tpu.memory_space<vmem>>, vector<32x16xf32>
    %c0_1 = arith.constant 0 : index
    %c0_2 = arith.constant 0 : index
    %1 = vector.load %arg1[%c0_1, %c0_2] : memref<128x16xf32, #tpu.memory_space<vmem>>, vector<128x16xf32>
    %cst = arith.constant dense<0.000000e+00> : vector<32x128xf32>
    %2 = tpu.matmul %0, %1, %cst {dimension_numbers = #tpu.dot_dimension_numbers<[1], [1], [0], [0], [0, 0, 1, 0], [], []>} : vector<32x16xf32>, vector<128x16xf32>, vector<32x128xf32> -> vector<32x128xf32>
    %c0_3 = arith.constant 0 : index
    %c0_4 = arith.constant 0 : index
    %3 = vector.load %arg3[%c0_3, %c0_4] : memref<32x1xf32, #tpu.memory_space<vmem>>, vector<32x1xf32>
    %4 = vector.broadcast %3 : vector<32x1xf32> to vector<32x128xf32>
    %5 = arith.addf %2, %4 : vector<32x128xf32>
    %cst_5 = arith.constant 0.000000e+00 : f32
    %6 = vector.broadcast %cst_5 : f32 to vector<32x128xf32>
    %7 = arith.maximumf %5, %6 : vector<32x128xf32>
    %c0_6 = arith.constant 0 : index
    %c0_7 = arith.constant 0 : index
    %8 = vector.load %arg4[%c0_6, %c0_7] : memref<32x1xf32, #tpu.memory_space<vmem>>, vector<32x1xf32>
    %9 = vector.broadcast %8 : vector<32x1xf32> to vector<32x128xf32>
    %10 = arith.mulf %7, %9 : vector<32x128xf32>
    %cst_8 = arith.constant dense<0.000000e+00> : vector<128xf32>
    %11 = vector.multi_reduction <add>, %10, %cst_8 [0] : vector<32x128xf32> to vector<128xf32>
    %12 = vector.shape_cast %11 : vector<128xf32> to vector<1x128xf32>
    %c0_9 = arith.constant 0 : index
    %c0_10 = arith.constant 0 : index
    %13 = vector.load %arg5[%c0_9, %c0_10] : memref<1x128xf32, #tpu.memory_space<vmem>>, vector<1x128xf32>
    tpu.vector_store %arg5[%c0_9, %c0_10], %12 {strides = array<i32>} : memref<1x128xf32, #tpu.memory_space<vmem>>, vector<1x128xf32>,
    return
  }
  func.func @transform_0(%arg0: i32) -> (i32, i32) {
    %c0_i32 = arith.constant 0 : i32
    %c0_i32_0 = arith.constant 0 : i32
    return %arg0, %c0_i32 : i32, i32
  }
  func.func @transform_1(%arg0: i32) -> (i32, i32) {
    %c0_i32 = arith.constant 0 : i32
    %c0_i32_0 = arith.constant 0 : i32
    %c0_i32_1 = arith.constant 0 : i32
    return %c0_i32, %c0_i32_0 : i32, i32
  }
  func.func @transform_2(%arg0: i32) -> (i32, i32) {
    %c0_i32 = arith.constant 0 : i32
    %c0_i32_0 = arith.constant 0 : i32
    %c0_i32_1 = arith.constant 0 : i32
    return %c0_i32, %c0_i32_0 : i32, i32
  }
  func.func @transform_3(%arg0: i32) -> (i32, i32) {
    %c0_i32 = arith.constant 0 : i32
    %c0_i32_0 = arith.constant 0 : i32
    %c0_i32_1 = arith.constant 0 : i32
    return %c0_i32, %c0_i32_0 : i32, i32
  }
  func.func @transform_4(%arg0: i32) -> (i32, i32) {
    %c0_i32 = arith.constant 0 : i32
    %c0_i32_0 = arith.constant 0 : i32
    return %c0_i32, %arg0 : i32, i32
  }
}

</mosaic_0001>

<bundles_post_ra>
// kernel: tpu_custom_call.1
= control target key start
LH: loop header
LB: loop body
LE: loop exit
PB: predicated region body
PF: predicated region fallthrough
CT: control target
= control target key end

     0   :  { %vm62_vm0 = vcmask 130048   ;;  %v434_v6 = vmov 0   ;;  %s631_s0 = inlined_call_operand.vmem [shape: f32[128,16], index: 0, kind: input, shape index: {}]   ;;  %s632_s1 = inlined_call_operand.vmem [shape: f32[32,16], index: 1, kind: input, shape index: {}]   ;;  %s633_s2 = inlined_call_operand.vmem [shape: f32[32,1], index: 2, kind: input, shape index: {}]   ;;  %s634_s3 = inlined_call_operand.vmem [shape: f32[32,1], index: 3, kind: input, shape index: {}]   ;;  %s635_s4 = inlined_call_operand.hbm [shape: f32[1,128], index: 4, kind: output, shape index: {}]  }
   0x1   :  { %v22_v0 = vld [vmem:[%s631_s0] sm:$0xff]  ;;  %v23_v1 = vld [vmem:[%s631_s0 + $0x8] sm:$0xff]  ;;  %v24_v2 = vld [vmem:[%s631_s0 + $0x10] sm:$0xff]  ;;  %408 = vset.pattern.permute.xlu0 %v434_v6  ;;  %409 = vset.pattern.permute.xlu1 %v434_v6 }
   0x2   :  { %v342_v3 = vpack.c.bf16 %v23_v1, %v22_v0  ;;  %vm472_vm1 = vmpackc.low %vm62_vm0, %vm62_vm0  ;;  %v25_v5 = vld [vmem:[%s631_s0 + $0x18] sm:$0xff]  ;;  %v18_v8 = vld [vmem:[%s632_s1] sm:$0xff] }
   0x3   :  { %v348_v7 = vpack.c.bf16 %v25_v5, %v24_v2  ;;  %v26_v9 = vld [vmem:[%s631_s0 + $0x20] sm:$0xff]  ;;  %v27_v10 = vld [vmem:[%s631_s0 + $0x28] sm:$0xff]  ;;  %336 = vmatprep.mubr.msk.f32.mxu0 %vm62_vm0, %v18_v8  ;;  %v20_v11 = vld [vmem:[%s632_s1 + $0x10] sm:$0xff] }
   0x4   :  { %344 = vmatprep.subr.msk.bf16.mxu0 %vm472_vm1, %v342_v3  ;;  %390 = vmatprep.subr.msk.bf16.mxu1 %vm472_vm1, %v342_v3  ;;  %v38_v12 = vld [vmem:[%s633_s2] sm:$0xff]  ;;  %v40_v13 = vld [vmem:[%s633_s2 + $0x10] sm:$0xff]  ;;  %v354_v14 = vpack.c.bf16 %v27_v10, %v26_v9 }
   0x5   :  { %347 = vmatpush3.bf16.xpose.msk.msra.mxu0 %vm472_vm1, %v342_v3  ;;  %398 = vmatpush3.bf16.xpose.msk.msra.mxu1 %vm472_vm1, %v342_v3 }
   0x6   :  { %350 = vmatprep.subr.msk.bf16.mxu0 %vm472_vm1, %v348_v7  ;;  %391 = vmatprep.subr.msk.bf16.mxu1 %vm472_vm1, %v348_v7 }
   0x7   :  { %339 = vmatprep.mubr.msk.f32.mxu1 %vm62_vm0, %v20_v11  ;;  %44 = vperm.xlu0 %408, %v38_v12  }
   0x8   :  { %54 = vperm.xlu1 %409, %v40_v13  }
   0x9   :  { %9 = vsyncpa [#allocation3], 0  ;;  %v39_v15 = vld [vmem:[%s633_s2 + $0x8] sm:$0xff]  ;;  %v41_v16 = vld [vmem:[%s633_s2 + $0x18] sm:$0xff] }
   0xa   :  { %v28_v17 = vld [vmem:[%s631_s0 + $0x30] sm:$0xff]  ;;  %v29_v18 = vld [vmem:[%s631_s0 + $0x38] sm:$0xff]  ;;  %v212_v19 = vld [vmem:[%s634_s3] sm:$0xff] }
   0xb   :  { %49 = vperm.xlu0 %408, %v39_v15   ;;  %v213_v20 = vld [vmem:[%s634_s3 + $0x8] sm:$0xff]  ;;  %v360_v21 = vpack.c.bf16 %v29_v18, %v28_v17  ;;  %v214_v22 = vld [vmem:[%s634_s3 + $0x10] sm:$0xff]  ;;  %v215_v23 = vld [vmem:[%s634_s3 + $0x18] sm:$0xff] }
   0xc   :  { %59 = vperm.xlu1 %409, %v41_v16   ;;  %v30_v24 = vld [vmem:[%s631_s0 + $0x40] sm:$0xff]  ;;  %v31_v25 = vld [vmem:[%s631_s0 + $0x48] sm:$0xff]  ;;  %v32_v27 = vld [vmem:[%s631_s0 + $0x50] sm:$0xff] }
   0xd   :  { %353 = vmatpush3.bf16.xpose.msk.msra.mxu0 %vm472_vm1, %v348_v7  ;;  %399 = vmatpush3.bf16.xpose.msk.msra.mxu1 %vm472_vm1, %v348_v7  ;;  %v366_v26 = vpack.c.bf16 %v31_v25, %v30_v24  ;;  %v33_v28 = vld [vmem:[%s631_s0 + $0x58] sm:$0xff]  ;;  %v34_v30 = vld [vmem:[%s631_s0 + $0x60] sm:$0xff]  ;;  %v35_v31 = vld [vmem:[%s631_s0 + $0x68] sm:$0xff] }
   0xe   :  { %356 = vmatprep.subr.msk.bf16.mxu0 %vm472_vm1, %v354_v14  ;;  %392 = vmatprep.subr.msk.bf16.mxu1 %vm472_vm1, %v354_v14  ;;  %v372_v29 = vpack.c.bf16 %v33_v28, %v32_v27  ;;  %v378_v32 = vpack.c.bf16 %v35_v31, %v34_v30  ;;  %v36_v33 = vld [vmem:[%s631_s0 + $0x70] sm:$0xff]  ;;  %v37_v34 = vld [vmem:[%s631_s0 + $0x78] sm:$0xff]  ;;  %v19_v36 = vld [vmem:[%s632_s1 + $0x8] sm:$0xff] }
   0xf   :  { %218 = vperm.xlu0 %408, %v212_v19   ;;  %v384_v35 = vpack.c.bf16 %v37_v34, %v36_v33  ;;  %v21_v37 = vld [vmem:[%s632_s1 + $0x18] sm:$0xff]  ;;  %s435_s1 = smov [#allocation2]  }
  0x10   :  { %223 = vperm.xlu1 %409, %v213_v20   ;;  %s256_s16 = sshll.u32 %s435_s1, 4  ;;  %s257_s16 = int_to_ptr.vmem [resolvable:$true] %s256_s16 }
  0x11   :  { %s410_s2 = scalar_lea.vmem %s257_s16, 16  ;;  %s414_s17 = scalar_lea.vmem %s257_s16, 32 }
  0x12   :  { %p411_p0 = scmp.ne.s32.totalorder %s257_s16, %s410_s2  ;;  %p415_p1 = scmp.lt.s32.totalorder %s257_s16, %s257_s16 }
  0x13   :  { %228 = vperm.xlu0 %408, %v214_v22   ;;  %p416_p2 = scmp.lt.s32.totalorder %s414_s17, %s410_s2 }
  0x14   :  { %233 = vperm.xlu1 %409, %v215_v23  }
  0x15   :  { %359 = vmatpush3.bf16.xpose.msk.msra.mxu0 %vm472_vm1, %v354_v14  ;;  %400 = vmatpush3.bf16.xpose.msk.msra.mxu1 %vm472_vm1, %v354_v14  ;;  %p417_p3 = por %p416_p2, %p415_p1 }
  0x16   :  { %362 = vmatprep.subr.msk.bf16.mxu0 %vm472_vm1, %v360_v21  ;;  %393 = vmatprep.subr.msk.bf16.mxu1 %vm472_vm1, %v360_v21 }
  0x17   :  { %p418_p4 = pnand %p417_p3, %p411_p0 }
  0x1d   :  { %365 = vmatpush3.bf16.xpose.msk.msra.mxu0 %vm472_vm1, %v360_v21  ;;  %401 = vmatpush3.bf16.xpose.msk.msra.mxu1 %vm472_vm1, %v360_v21 }
  0x1e   :  { %368 = vmatprep.subr.msk.bf16.mxu0 %vm472_vm1, %v366_v26  ;;  %394 = vmatprep.subr.msk.bf16.mxu1 %vm472_vm1, %v366_v26 }
  0x25   :  { %371 = vmatpush3.bf16.xpose.msk.msra.mxu0 %vm472_vm1, %v366_v26  ;;  %402 = vmatpush3.bf16.xpose.msk.msra.mxu1 %vm472_vm1, %v366_v26 }
  0x26   :  { %374 = vmatprep.subr.msk.bf16.mxu0 %vm472_vm1, %v372_v29  ;;  %395 = vmatprep.subr.msk.bf16.mxu1 %vm472_vm1, %v372_v29 }
  0x2d   :  { %377 = vmatpush3.bf16.xpose.msk.msra.mxu0 %vm472_vm1, %v372_v29  ;;  %403 = vmatpush3.bf16.xpose.msk.msra.mxu1 %vm472_vm1, %v372_v29 }
  0x2e   :  { %380 = vmatprep.subr.msk.bf16.mxu0 %vm472_vm1, %v378_v32  ;;  %396 = vmatprep.subr.msk.bf16.mxu1 %vm472_vm1, %v378_v32 }
  0x35   :  { %383 = vmatpush3.bf16.xpose.msk.msra.mxu0 %vm472_vm1, %v378_v32  ;;  %404 = vmatpush3.bf16.xpose.msk.msra.mxu1 %vm472_vm1, %v378_v32 }
  0x36   :  { %386 = vmatprep.subr.msk.bf16.mxu0 %vm472_vm1, %v384_v35  ;;  %397 = vmatprep.subr.msk.bf16.mxu1 %vm472_vm1, %v384_v35 }
  0x3d   :  { %389 = vmatpush3.bf16.xpose.msk.msra.mxu0 %vm472_vm1, %v384_v35  ;;  %405 = vmatpush3.bf16.xpose.msk.msra.mxu1 %vm472_vm1, %v384_v35 }
  0x44   :  { %337 = vmatmul.mubr.msk.f32.vlgmr.msra.gmra.mrb[0].mxu0 %vm62_vm0, %v19_v36  ;;  %340 = vmatmul.mubr.msk.f32.vlgmr.msra.gmra.mrb[0].mxu1 %vm62_vm0, %v21_v37 }
  0x86   :  { %v45_v38 = vpop.permute.xlu0 %44 }
  0x87   :  { %v55_v39 = vpop.permute.xlu1 %54 }
  0x8a   :  { %v50_v40 = vpop.permute.xlu0 %49 }
  0x8b   :  { %v60_v41 = vpop.permute.xlu1 %59 }
  0x8e   :  { %v219_v42 = vpop.permute.xlu0 %218 }
  0x8f   :  { %v224_v51 = vpop.permute.xlu1 %223 }
  0x92   :  { %v229_v58 = vpop.permute.xlu0 %228 }
  0x93   :  { %v234_v61 = vpop.permute.xlu1 %233 }
 0x117   :  { %v338_v43 = vpop.f32.mrb[0].mxu0  ;;  %v341_v44 = vpop.f32.mrb[0].mxu1 }
 0x118   :  { %v195_v45 = vadd.f32 %v338_v43, %v50_v40  ;;  %v189_v46 = vpop.f32.mrb[1].mxu0  ;;  %v199_v47 = vpop.f32.mrb[1].mxu1  ;;  %v205_v48 = vadd.f32 %v341_v44, %v60_v41 }
 0x119   :  { %v190_v49 = vadd.f32 %v189_v46, %v45_v38  ;;  %v200_v50 = vadd.f32 %v199_v47, %v55_v39 }
 0x11a   :  { %v209_v52 = vmax.f32 %v195_v45, 0.0  ;;  %v211_v56 = vmax.f32 %v205_v48, 0.0 }
 0x11b   :  { %v208_v53 = vmax.f32 %v190_v49, 0.0  ;;  %v210_v54 = vmax.f32 %v200_v50, 0.0 }
 0x11c   :  { %v237_v55 = vmul.f32 %v224_v51, %v209_v52  ;;  %v239_v62 = vmul.f32 %v234_v61, %v211_v56 }
 0x11d   :  { %v236_v57 = vmul.f32 %v219_v42, %v208_v53  ;;  %v238_v60 = vmul.f32 %v229_v58, %v210_v54 }
 0x11f   :  { %v240_v59 = vadd.f32 %v237_v55, %v236_v57 }
 0x121   :  { %v241_v63 = vadd.f32 %v240_v59, %v238_v60 }
 0x123   :  { %v242_v0 = vadd.f32 %v241_v63, %v239_v62 }
 0x125   :  { %v243_v1 = vrot.slane %v242_v0, 4 }
 0x127   :  { %v244_v2 = vadd.f32 %v243_v1, %v242_v0 }
 0x129   :  { %v245_v3 = vrot.slane %v244_v2, 2 }
 0x12b   :  { %v246_v4 = vadd.f32 %v245_v3, %v244_v2 }
 0x12d   :  { %v247_v5 = vrot.slane %v246_v4, 1 }
 0x12f   :  { %v248_v6 = vadd.f32 %v247_v5, %v246_v4 }
 0x131   :  { %249 = vst [vmem:[#allocation2] sm:$0x1] %v248_v6 }
 0x132   :  { %421 = shalt.err (!%p418_p4)
}
 0x133   :  { %s422_s20 = scalar_lea.hbm %s635_s4, 16 }
 0x134   :  { %p423_p5 = scmp.ne.s32.totalorder %s635_s4, %s422_s20  ;;  %p426_p6 = scmp.lt.u32.totalorder %s422_s20, %s635_s4 }
 0x136   :  { %p428_p7 = pnand %p426_p6, %p423_p5 }
 0x138   :  { %431 = shalt.err (!%p428_p7)
}
 0x139   :  { %259 = dma.vmem_to_hbm [thread:$0]  %s257_s16, 16, %s635_s4, [#allocation3]  }
 0x13a   :  { %432 = dma.done.wait [#allocation3], 16  }
 0x13b   :  { %433 = vsyncadd [#allocation3], 4294967280 }
 0x13c   :  { %263 = vsyncpa [#allocation3], 1 }

// kernel: tpu_custom_call.1
= control target key start
LH: loop header
LB: loop body
LE: loop exit
PB: predicated region body
PF: predicated region fallthrough
CT: control target
= control target key end

     0   :  { %vm62_vm0 = vcmask 130048   ;;  %v434_v6 = vmov 0   ;;  %s631_s0 = inlined_call_operand.vmem [shape: f32[128,16], index: 0, kind: input, shape index: {}]   ;;  %s632_s1 = inlined_call_operand.vmem [shape: f32[32,16], index: 1, kind: input, shape index: {}]   ;;  %s633_s2 = inlined_call_operand.vmem [shape: f32[32,1], index: 2, kind: input, shape index: {}]   ;;  %s634_s3 = inlined_call_operand.vmem [shape: f32[32,1], index: 3, kind: input, shape index: {}]   ;;  %s635_s4 = inlined_call_operand.hbm [shape: f32[1,128], index: 4, kind: output, shape index: {}]  }
   0x1   :  { %v22_v0 = vld [vmem:[%s631_s0] sm:$0xff]  ;;  %v23_v1 = vld [vmem:[%s631_s0 + $0x8] sm:$0xff]  ;;  %v24_v2 = vld [vmem:[%s631_s0 + $0x10] sm:$0xff]  ;;  %408 = vset.pattern.permute.xlu0 %v434_v6  ;;  %409 = vset.pattern.permute.xlu1 %v434_v6 }
   0x2   :  { %v342_v3 = vpack.c.bf16 %v23_v1, %v22_v0  ;;  %vm472_vm1 = vmpackc.low %vm62_vm0, %vm62_vm0  ;;  %v25_v5 = vld [vmem:[%s631_s0 + $0x18] sm:$0xff]  ;;  %v18_v8 = vld [vmem:[%s632_s1] sm:$0xff] }
   0x3   :  { %v348_v7 = vpack.c.bf16 %v25_v5, %v24_v2  ;;  %v26_v9 = vld [vmem:[%s631_s0 + $0x20] sm:$0xff]  ;;  %v27_v10 = vld [vmem:[%s631_s0 + $0x28] sm:$0xff]  ;;  %336 = vmatprep.mubr.msk.f32.mxu0 %vm62_vm0, %v18_v8  ;;  %v20_v11 = vld [vmem:[%s632_s1 + $0x10] sm:$0xff] }
   0x4   :  { %344 = vmatprep.subr.msk.bf16.mxu0 %vm472_vm1, %v342_v3  ;;  %390 = vmatprep.subr.msk.bf16.mxu1 %vm472_vm1, %v342_v3  ;;  %v38_v12 = vld [vmem:[%s633_s2] sm:$0xff]  ;;  %v40_v13 = vld [vmem:[%s633_s2 + $0x10] sm:$0xff]  ;;  %v354_v14 = vpack.c.bf16 %v27_v10, %v26_v9 }
   0x5   :  { %347 = vmatpush3.bf16.xpose.msk.msra.mxu0 %vm472_vm1, %v342_v3  ;;  %398 = vmatpush3.bf16.xpose.msk.msra.mxu1 %vm472_vm1, %v342_v3 }
   0x6   :  { %350 = vmatprep.subr.msk.bf16.mxu0 %vm472_vm1, %v348_v7  ;;  %391 = vmatprep.subr.msk.bf16.mxu1 %vm472_vm1, %v348_v7 }
   0x7   :  { %339 = vmatprep.mubr.msk.f32.mxu1 %vm62_vm0, %v20_v11  ;;  %44 = vperm.xlu0 %408, %v38_v12  }
   0x8   :  { %54 = vperm.xlu1 %409, %v40_v13  }
   0x9   :  { %9 = vsyncpa [#allocation3], 0  ;;  %v39_v15 = vld [vmem:[%s633_s2 + $0x8] sm:$0xff]  ;;  %v41_v16 = vld [vmem:[%s633_s2 + $0x18] sm:$0xff] }
   0xa   :  { %v28_v17 = vld [vmem:[%s631_s0 + $0x30] sm:$0xff]  ;;  %v29_v18 = vld [vmem:[%s631_s0 + $0x38] sm:$0xff]  ;;  %v212_v19 = vld [vmem:[%s634_s3] sm:$0xff] }
   0xb   :  { %49 = vperm.xlu0 %408, %v39_v15   ;;  %v213_v20 = vld [vmem:[%s634_s3 + $0x8] sm:$0xff]  ;;  %v360_v21 = vpack.c.bf16 %v29_v18, %v28_v17  ;;  %v214_v22 = vld [vmem:[%s634_s3 + $0x10] sm:$0xff]  ;;  %v215_v23 = vld [vmem:[%s634_s3 + $0x18] sm:$0xff] }
   0xc   :  { %59 = vperm.xlu1 %409, %v41_v16   ;;  %v30_v24 = vld [vmem:[%s631_s0 + $0x40] sm:$0xff]  ;;  %v31_v25 = vld [vmem:[%s631_s0 + $0x48] sm:$0xff]  ;;  %v32_v27 = vld [vmem:[%s631_s0 + $0x50] sm:$0xff] }
   0xd   :  { %353 = vmatpush3.bf16.xpose.msk.msra.mxu0 %vm472_vm1, %v348_v7  ;;  %399 = vmatpush3.bf16.xpose.msk.msra.mxu1 %vm472_vm1, %v348_v7  ;;  %v366_v26 = vpack.c.bf16 %v31_v25, %v30_v24  ;;  %v33_v28 = vld [vmem:[%s631_s0 + $0x58] sm:$0xff]  ;;  %v34_v30 = vld [vmem:[%s631_s0 + $0x60] sm:$0xff]  ;;  %v35_v31 = vld [vmem:[%s631_s0 + $0x68] sm:$0xff] }
   0xe   :  { %356 = vmatprep.subr.msk.bf16.mxu0 %vm472_vm1, %v354_v14  ;;  %392 = vmatprep.subr.msk.bf16.mxu1 %vm472_vm1, %v354_v14  ;;  %v372_v29 = vpack.c.bf16 %v33_v28, %v32_v27  ;;  %v378_v32 = vpack.c.bf16 %v35_v31, %v34_v30  ;;  %v36_v33 = vld [vmem:[%s631_s0 + $0x70] sm:$0xff]  ;;  %v37_v34 = vld [vmem:[%s631_s0 + $0x78] sm:$0xff]  ;;  %v19_v36 = vld [vmem:[%s632_s1 + $0x8] sm:$0xff] }
   0xf   :  { %218 = vperm.xlu0 %408, %v212_v19   ;;  %v384_v35 = vpack.c.bf16 %v37_v34, %v36_v33  ;;  %v21_v37 = vld [vmem:[%s632_s1 + $0x18] sm:$0xff]  ;;  %s435_s1 = smov [#allocation2]  }
  0x10   :  { %223 = vperm.xlu1 %409, %v213_v20   ;;  %s256_s16 = sshll.u32 %s435_s1, 4  ;;  %s257_s16 = int_to_ptr.vmem [resolvable:$true] %s256_s16 }
  0x11   :  { %s410_s2 = scalar_lea.vmem %s257_s16, 16  ;;  %s414_s17 = scalar_lea.vmem %s257_s16, 32 }
  0x12   :  { %p411_p0 = scmp.ne.s32.totalorder %s257_s16, %s410_s2  ;;  %p415_p1 = scmp.lt.s32.totalorder %s257_s16, %s257_s16 }
  0x13   :  { %228 = vperm.xlu0 %408, %v214_v22   ;;  %p416_p2 = scmp.lt.s32.totalorder %s414_s17, %s410_s2 }
  0x14   :  { %233 = vperm.xlu1 %409, %v215_v23  }
  0x15   :  { %359 = vmatpush3.bf16.xpose.msk.msra.mxu0 %vm472_vm1, %v354_v14  ;;  %400 = vmatpush3.bf16.xpose.msk.msra.mxu1 %vm472_vm1, %v354_v14  ;;  %p417_p3 = por %p416_p2, %p415_p1 }
  0x16   :  { %362 = vmatprep.subr.msk.bf16.mxu0 %vm472_vm1, %v360_v21  ;;  %393 = vmatprep.subr.msk.bf16.mxu1 %vm472_vm1, %v360_v21 }
  0x17   :  { %p418_p4 = pnand %p417_p3, %p411_p0 }
  0x1d   :  { %365 = vmatpush3.bf16.xpose.msk.msra.mxu0 %vm472_vm1, %v360_v21  ;;  %401 = vmatpush3.bf16.xpose.msk.msra.mxu1 %vm472_vm1, %v360_v21 }
  0x1e   :  { %368 = vmatprep.subr.msk.bf16.mxu0 %vm472_vm1, %v366_v26  ;;  %394 = vmatprep.subr.msk.bf16.mxu1 %vm472_vm1, %v366_v26 }
  0x25   :  { %371 = vmatpush3.bf16.xpose.msk.msra.mxu0 %vm472_vm1, %v366_v26  ;;  %402 = vmatpush3.bf16.xpose.msk.msra.mxu1 %vm472_vm1, %v366_v26 }
  0x26   :  { %374 = vmatprep.subr.msk.bf16.mxu0 %vm472_vm1, %v372_v29  ;;  %395 = vmatprep.subr.msk.bf16.mxu1 %vm472_vm1, %v372_v29 }
  0x2d   :  { %377 = vmatpush3.bf16.xpose.msk.msra.mxu0 %vm472_vm1, %v372_v29  ;;  %403 = vmatpush3.bf16.xpose.msk.msra.mxu1 %vm472_vm1, %v372_v29 }
  0x2e   :  { %380 = vmatprep.subr.msk.bf16.mxu0 %vm472_vm1, %v378_v32  ;;  %396 = vmatprep.subr.msk.bf16.mxu1 %vm472_vm1, %v378_v32 }
  0x35   :  { %383 = vmatpush3.bf16.xpose.msk.msra.mxu0 %vm472_vm1, %v378_v32  ;;  %404 = vmatpush3.bf16.xpose.msk.msra.mxu1 %vm472_vm1, %v378_v32 }
  0x36   :  { %386 = vmatprep.subr.msk.bf16.mxu0 %vm472_vm1, %v384_v35  ;;  %397 = vmatprep.subr.msk.bf16.mxu1 %vm472_vm1, %v384_v35 }
  0x3d   :  { %389 = vmatpush3.bf16.xpose.msk.msra.mxu0 %vm472_vm1, %v384_v35  ;;  %405 = vmatpush3.bf16.xpose.msk.msra.mxu1 %vm472_vm1, %v384_v35 }
  0x44   :  { %337 = vmatmul.mubr.msk.f32.vlgmr.msra.gmra.mrb[0].mxu0 %vm62_vm0, %v19_v36  ;;  %340 = vmatmul.mubr.msk.f32.vlgmr.msra.gmra.mrb[0].mxu1 %vm62_vm0, %v21_v37 }
  0x86   :  { %v45_v38 = vpop.permute.xlu0 %44 }
  0x87   :  { %v55_v39 = vpop.permute.xlu1 %54 }
  0x8a   :  { %v50_v40 = vpop.permute.xlu0 %49 }
  0x8b   :  { %v60_v41 = vpop.permute.xlu1 %59 }
  0x8e   :  { %v219_v42 = vpop.permute.xlu0 %218 }
  0x8f   :  { %v224_v51 = vpop.permute.xlu1 %223 }
  0x92   :  { %v229_v58 = vpop.permute.xlu0 %228 }
  0x93   :  { %v234_v61 = vpop.permute.xlu1 %233 }
 0x117   :  { %v338_v43 = vpop.f32.mrb[0].mxu0  ;;  %v341_v44 = vpop.f32.mrb[0].mxu1 }
 0x118   :  { %v195_v45 = vadd.f32 %v338_v43, %v50_v40  ;;  %v189_v46 = vpop.f32.mrb[1].mxu0  ;;  %v199_v47 = vpop.f32.mrb[1].mxu1  ;;  %v205_v48 = vadd.f32 %v341_v44, %v60_v41 }
 0x119   :  { %v190_v49 = vadd.f32 %v189_v46, %v45_v38  ;;  %v200_v50 = vadd.f32 %v199_v47, %v55_v39 }
 0x11a   :  { %v209_v52 = vmax.f32 %v195_v45, 0.0  ;;  %v211_v56 = vmax.f32 %v205_v48, 0.0 }
 0x11b   :  { %v208_v53 = vmax.f32 %v190_v49, 0.0  ;;  %v210_v54 = vmax.f32 %v200_v50, 0.0 }
 0x11c   :  { %v237_v55 = vmul.f32 %v224_v51, %v209_v52  ;;  %v239_v62 = vmul.f32 %v234_v61, %v211_v56 }
 0x11d   :  { %v236_v57 = vmul.f32 %v219_v42, %v208_v53  ;;  %v238_v60 = vmul.f32 %v229_v58, %v210_v54 }
 0x11f   :  { %v240_v59 = vadd.f32 %v237_v55, %v236_v57 }
 0x121   :  { %v241_v63 = vadd.f32 %v240_v59, %v238_v60 }
 0x123   :  { %v242_v0 = vadd.f32 %v241_v63, %v239_v62 }
 0x125   :  { %v243_v1 = vrot.slane %v242_v0, 4 }
 0x127   :  { %v244_v2 = vadd.f32 %v243_v1, %v242_v0 }
 0x129   :  { %v245_v3 = vrot.slane %v244_v2, 2 }
 0x12b   :  { %v246_v4 = vadd.f32 %v245_v3, %v244_v2 }
 0x12d   :  { %v247_v5 = vrot.slane %v246_v4, 1 }
 0x12f   :  { %v248_v6 = vadd.f32 %v247_v5, %v246_v4 }
 0x131   :  { %249 = vst [vmem:[#allocation2] sm:$0x1] %v248_v6 }
 0x132   :  { %421 = shalt.err (!%p418_p4)
}
 0x133   :  { %s422_s20 = scalar_lea.hbm %s635_s4, 16 }
 0x134   :  { %p423_p5 = scmp.ne.s32.totalorder %s635_s4, %s422_s20  ;;  %p426_p6 = scmp.lt.u32.totalorder %s422_s20, %s635_s4 }
 0x136   :  { %p428_p7 = pnand %p426_p6, %p423_p5 }
 0x138   :  { %431 = shalt.err (!%p428_p7)
}
 0x139   :  { %259 = dma.vmem_to_hbm [thread:$0]  %s257_s16, 16, %s635_s4, [#allocation3]  }
 0x13a   :  { %432 = dma.done.wait [#allocation3], 16  }
 0x13b   :  { %433 = vsyncadd [#allocation3], 4294967280 }
 0x13c   :  { %263 = vsyncpa [#allocation3], 1 }

</bundles_post_ra>
